<compile_context>
chip_gen: v7x
topology: tpu7x:2x2x1
jax: 0.10.0
libtpu: 0.0.40
codegen_flags: <defaults>
</compile_context>

<pallas_src>
import functools
import math

import jax
import jax.numpy as jnp
from jax.experimental import pallas as pl
from jax.experimental.pallas import tpu as pltpu

BN_EPS = 1e-5


def _bn_relu(h, gamma, beta):
    """Train-mode BatchNorm over axis 0 (all B*C rows) + ReLU, one fused reduction."""
    n = h.shape[1]
    # Single XLU reduction for both moments: reduce [h | h*h] along the batch axis.
    moments = jnp.mean(jnp.concatenate([h, h * h], axis=1), axis=0, keepdims=True)
    mean, meansq = moments[:, :n], moments[:, n:]
    var = jnp.maximum(meansq - mean * mean, 0.0)
    scale = gamma * jax.lax.rsqrt(var + BN_EPS)          # EUP rsqrt
    return jnp.maximum((h - mean) * scale + beta, 0.0)


def _nhits_kernel(kernel_sizes, L, H, horizon, sec_rows, offs,
                  x_ref, slab_ref, y_ref):
    """Fused 3-block N-HiTS forward; residual chain never leaves vregs/VMEM."""
    O_W1, O_W2, O_V, O_WB, O_WF = offs
    x = x_ref[...]                                       # (R, L) f32 residual
    n_blocks = len(kernel_sizes)

    for s in range(n_blocks):                            # statically unrolled
        k = kernel_sizes[s]
        lw = L - k + 1                                   # number of pooling windows
        base = s * sec_rows                              # static, 8-row aligned

        # ---- MaxPool1d window max (stride selection pre-folded into w1) -----
        wmax = x[:, 0:lw]
        for j in range(1, k):
            wmax = jnp.maximum(wmax, x[:, j:j + lw])

        # ---- per-block BN affine params: one aligned 8-row load --------------
        v = slab_ref[base + O_V: base + O_V + 8, :]      # rows g1, be1, g2, be2, pad
        g1, be1 = v[0:1, :H], v[1:2, :H]
        g2, be2 = v[2:3, :H], v[3:4, :H]

        # ---- dense_hid_1 (bias is a no-op under train-mode BN) + BN1 + ReLU --
        w1 = slab_ref[base + O_W1: base + O_W1 + lw, :][:, :H]
        h = jnp.dot(wmax, w1, preferred_element_type=jnp.float32)
        h = _bn_relu(h, g1, be1)

        # ---- dense_hid_2 + BN2 + ReLU -----------------------------------------
        w2 = slab_ref[base + O_W2: base + O_W2 + H, :][:, :H]
        h = jnp.dot(h, w2, preferred_element_type=jnp.float32)
        h = _bn_relu(h, g2, be2)

        # ---- forecast (interp folded): full 8-row matmul + unmasked store -----
        wf = slab_ref[base + O_WF: base + O_WF + H, :][:, :horizon]
        y_ref[s] = jnp.dot(h, wf, preferred_element_type=jnp.float32)

        # ---- residual chain: x_next = x - (x - theta_b) = theta_b -------------
        # theta_b of the last block is never consumed -> skip entirely.
        if s < n_blocks - 1:
            wb = slab_ref[base + O_WB: base + O_WB + H, :][:, :L]
            x = jnp.dot(h, wb, preferred_element_type=jnp.float32)


def nhits_forward(x, slab, kernel_sizes, H, horizon, sec_rows, offs):
    """NHiTS.forward: returns (y_hat_1, y_hat_2, y_hat_3), each (B, 1, horizon)."""
    B, C, L = x.shape
    # Feature-major row layout (rows = c*B + b): channel-0 rows are [0, B).
    xr = jnp.transpose(x, (1, 0, 2)).reshape(C * B, L).astype(jnp.float32)

    vmem = pl.BlockSpec(memory_space=pltpu.MemorySpace.VMEM)
    y_all = pl.pallas_call(
        functools.partial(_nhits_kernel, tuple(kernel_sizes), L, H, horizon,
                          sec_rows, tuple(offs)),
        out_shape=jax.ShapeDtypeStruct((len(kernel_sizes), C * B, horizon),
                                       jnp.float32),
        in_specs=[vmem, vmem],
        out_specs=vmem,
    )(xr, slab)

    # y_hat[:, :1, :] keeps channel 0 -> the first B rows of each block output.
    return tuple(y_all[s, :B, :][:, None, :] for s in range(len(kernel_sizes)))


def _round8(n):
    return ((n + 7) // 8) * 8


def init_params(key, kernel_sizes, expr_ratios, L, H, horizon, stride):
    """Deterministic synthetic parameters, pre-folded and packed into one slab."""
    W = max(H, L, horizon)                               # common lane width
    R_W1, R_W2, R_V, R_WB, R_WF = _round8(L), _round8(H), 8, _round8(H), _round8(H)
    O_W1 = 0
    O_W2 = O_W1 + R_W1
    O_V = O_W2 + R_W2
    O_WB = O_V + R_V
    O_WF = O_WB + R_WB
    sec_rows = O_WF + R_WF                               # per-block page rows (mult of 8)

    def rnd(k, shape, scale=0.1):
        return (scale * jax.random.normal(k, shape)).astype(jnp.float32)

    pages = []
    keys = jax.random.split(key, len(kernel_sizes))
    for kk, ksz, er in zip(keys, kernel_sizes, expr_ratios):
        Lp = (L - ksz) // stride + 1                     # MaxPool output length
        F = int(math.ceil(horizon / er))                 # dim_theta_f
        ks = jax.random.split(kk, 10)

        w1 = rnd(ks[0], (Lp, H))
        g1 = 1.0 + rnd(ks[2], (1, H)); be1 = rnd(ks[3], (1, H))
        w2 = rnd(ks[4], (H, H))
        g2 = 1.0 + rnd(ks[6], (1, H)); be2 = rnd(ks[7], (1, H))
        wb = rnd(ks[8], (H, L))
        wf = rnd(ks[9], (H, F))
        # NOTE: dense_hid_{1,2} biases are exact no-ops under train-mode BatchNorm
        # (constant per-feature shift cancels against the batch mean) -> not packed.

        page = jnp.zeros((sec_rows, W), jnp.float32)
        # Fold the MaxPool stride selection into dense_hid_1's weight (exact):
        # pooled @ w1 == window_max @ w1_fold, w1_fold[p*stride] = w1[p], else 0.
        page = page.at[O_W1 + jnp.arange(Lp) * stride, :H].set(w1)
        page = page.at[O_W2:O_W2 + H, :H].set(w2)
        page = page.at[O_V + 0, :H].set(g1[0])
        page = page.at[O_V + 1, :H].set(be1[0])
        page = page.at[O_V + 2, :H].set(g2[0])
        page = page.at[O_V + 3, :H].set(be2[0])
        page = page.at[O_WB:O_WB + H, :L].set(wb)
        # Fold nearest-neighbour interpolation into theta_f's weight (exact
        # column duplication): src index = floor(i * F / horizon).
        idx = (jnp.arange(horizon) * F) // horizon
        page = page.at[O_WF:O_WF + H, :horizon].set(wf[:, idx])
        pages.append(page)

    slab = jnp.concatenate(pages, axis=0)                # (3 * sec_rows, W)
    return slab, sec_rows, (O_W1, O_W2, O_V, O_WB, O_WF)


if __name__ == "__main__":
    # dict_params equivalent (small shapes)
    B, C = 2, 4                     # batch, num_features
    L = 16                          # data.len_input
    horizon = 8                     # data.horizon_forecast
    H = 32                          # model.n_neur_hidden
    stride = 2                      # model.stride_maxpool
    kernel_sizes = [4, 2, 2]        # stack_{1,2,3}.kernel_size_pool
    expr_ratios = [4, 2, 2]         # stack_{1,2,3}.expr_ratio_m1

    key = jax.random.PRNGKey(0)
    kx, kp = jax.random.split(key, 2)
    slab, sec_rows, offs = init_params(kp, kernel_sizes, expr_ratios,
                                       L, H, horizon, stride)

    x = jax.random.normal(kx, (B, C, L), dtype=jnp.float32)

    fwd = jax.jit(lambda xin: nhits_forward(xin, slab, kernel_sizes, H, horizon,
                                            sec_rows, offs))
    y1, y2, y3 = fwd(x)
    jax.block_until_ready((y1, y2, y3))

    assert y1.shape == (B, 1, horizon), y1.shape
    assert y2.shape == (B, 1, horizon), y2.shape
    assert y3.shape == (B, 1, horizon), y3.shape
    assert bool(jnp.all(jnp.isfinite(y1))) and bool(jnp.all(jnp.isfinite(y2))) \
        and bool(jnp.all(jnp.isfinite(y3)))

    print("KERNEL_OK")
</pallas_src>

<mosaic_0001>
module attributes {stable_mosaic.version = 11 : i64} {
  func.func @_nhits_kernel(%arg0: memref<8x16xf32, #tpu.memory_space<vmem>>, %arg1: memref<360x32xf32, #tpu.memory_space<vmem>>, %arg2: memref<3x8x8xf32, #tpu.memory_space<vmem>>) attributes {dimension_semantics = [], scalar_prefetch = 0 : i64, scratch_operands = 0 : i64, tpu.core_type = #tpu.core_type<tc>} {
    %c0 = arith.constant 0 : index
    %c0_0 = arith.constant 0 : index
    %0 = vector.load %arg0[%c0, %c0_0] : memref<8x16xf32, #tpu.memory_space<vmem>>, vector<8x16xf32>
    %1 = vector.extract_strided_slice %0 {offsets = [0, 0], sizes = [8, 13], strides = [1, 1]} : vector<8x16xf32> to vector<8x13xf32>
    %2 = vector.extract_strided_slice %0 {offsets = [0, 1], sizes = [8, 13], strides = [1, 1]} : vector<8x16xf32> to vector<8x13xf32>
    %3 = arith.maximumf %1, %2 : vector<8x13xf32>
    %4 = vector.extract_strided_slice %0 {offsets = [0, 2], sizes = [8, 13], strides = [1, 1]} : vector<8x16xf32> to vector<8x13xf32>
    %5 = arith.maximumf %3, %4 : vector<8x13xf32>
    %6 = vector.extract_strided_slice %0 {offsets = [0, 3], sizes = [8, 13], strides = [1, 1]} : vector<8x16xf32> to vector<8x13xf32>
    %7 = arith.maximumf %5, %6 : vector<8x13xf32>
    %c48 = arith.constant 48 : index
    %c0_1 = arith.constant 0 : index
    %8 = vector.load %arg1[%c48, %c0_1] : memref<360x32xf32, #tpu.memory_space<vmem>>, vector<8x32xf32>
    %9 = vector.extract_strided_slice %8 {offsets = [0, 0], sizes = [1, 32], strides = [1, 1]} : vector<8x32xf32> to vector<1x32xf32>
    %10 = vector.extract_strided_slice %8 {offsets = [1, 0], sizes = [1, 32], strides = [1, 1]} : vector<8x32xf32> to vector<1x32xf32>
    %11 = vector.extract_strided_slice %8 {offsets = [2, 0], sizes = [1, 32], strides = [1, 1]} : vector<8x32xf32> to vector<1x32xf32>
    %12 = vector.extract_strided_slice %8 {offsets = [3, 0], sizes = [1, 32], strides = [1, 1]} : vector<8x32xf32> to vector<1x32xf32>
    %c0_2 = arith.constant 0 : index
    %c0_3 = arith.constant 0 : index
    %13 = vector.load %arg1[%c0_2, %c0_3] : memref<360x32xf32, #tpu.memory_space<vmem>>, vector<13x32xf32>
    %cst = arith.constant dense<0.000000e+00> : vector<8x32xf32>
    %14 = tpu.matmul %7, %13, %cst {dimension_numbers = #tpu.dot_dimension_numbers<[1], [0], [0], [1], [0, 0, 1, 1], [], []>} : vector<8x13xf32>, vector<13x32xf32>, vector<8x32xf32> -> vector<8x32xf32>
    %15 = arith.mulf %14, %14 : vector<8x32xf32>
    %16 = tpu.concatenate %14, %15 in 1 : vector<8x32xf32>, vector<8x32xf32> -> vector<8x64xf32>
    %cst_4 = arith.constant dense<0.000000e+00> : vector<64xf32>
    %17 = vector.multi_reduction <add>, %16, %cst_4 [0] : vector<8x64xf32> to vector<64xf32>
    %18 = vector.shape_cast %17 : vector<64xf32> to vector<1x64xf32>
    %cst_5 = arith.constant 8.000000e+00 : f32
    %19 = vector.broadcast %cst_5 : f32 to vector<1x64xf32>
    %20 = arith.divf %18, %19 : vector<1x64xf32>
    %21 = vector.extract_strided_slice %20 {offsets = [0, 0], sizes = [1, 32], strides = [1, 1]} : vector<1x64xf32> to vector<1x32xf32>
    %22 = vector.extract_strided_slice %20 {offsets = [0, 32], sizes = [1, 32], strides = [1, 1]} : vector<1x64xf32> to vector<1x32xf32>
    %23 = arith.mulf %21, %21 : vector<1x32xf32>
    %24 = arith.subf %22, %23 : vector<1x32xf32>
    %cst_6 = arith.constant 0.000000e+00 : f32
    %25 = vector.broadcast %cst_6 : f32 to vector<1x32xf32>
    %26 = arith.maximumf %24, %25 : vector<1x32xf32>
    %cst_7 = arith.constant 9.99999974E-6 : f32
    %27 = vector.broadcast %cst_7 : f32 to vector<1x32xf32>
    %28 = arith.addf %26, %27 : vector<1x32xf32>
    %29 = math.rsqrt %28 : vector<1x32xf32>
    %30 = arith.mulf %9, %29 : vector<1x32xf32>
    %31 = vector.broadcast %21 : vector<1x32xf32> to vector<8x32xf32>
    %32 = arith.subf %14, %31 : vector<8x32xf32>
    %33 = vector.broadcast %30 : vector<1x32xf32> to vector<8x32xf32>
    %34 = arith.mulf %32, %33 : vector<8x32xf32>
    %35 = vector.broadcast %10 : vector<1x32xf32> to vector<8x32xf32>
    %36 = arith.addf %34, %35 : vector<8x32xf32>
    %cst_8 = arith.constant 0.000000e+00 : f32
    %37 = vector.broadcast %cst_8 : f32 to vector<8x32xf32>
    %38 = arith.maximumf %36, %37 : vector<8x32xf32>
    %c16 = arith.constant 16 : index
    %c0_9 = arith.constant 0 : index
    %39 = vector.load %arg1[%c16, %c0_9] : memref<360x32xf32, #tpu.memory_space<vmem>>, vector<32x32xf32>
    %cst_10 = arith.constant dense<0.000000e+00> : vector<8x32xf32>
    %40 = tpu.matmul %38, %39, %cst_10 {dimension_numbers = #tpu.dot_dimension_numbers<[1], [0], [0], [1], [0, 0, 1, 1], [], []>} : vector<8x32xf32>, vector<32x32xf32>, vector<8x32xf32> -> vector<8x32xf32>
    %41 = arith.mulf %40, %40 : vector<8x32xf32>
    %42 = tpu.concatenate %40, %41 in 1 : vector<8x32xf32>, vector<8x32xf32> -> vector<8x64xf32>
    %cst_11 = arith.constant dense<0.000000e+00> : vector<64xf32>
    %43 = vector.multi_reduction <add>, %42, %cst_11 [0] : vector<8x64xf32> to vector<64xf32>
    %44 = vector.shape_cast %43 : vector<64xf32> to vector<1x64xf32>
    %cst_12 = arith.constant 8.000000e+00 : f32
    %45 = vector.broadcast %cst_12 : f32 to vector<1x64xf32>
    %46 = arith.divf %44, %45 : vector<1x64xf32>
    %47 = vector.extract_strided_slice %46 {offsets = [0, 0], sizes = [1, 32], strides = [1, 1]} : vector<1x64xf32> to vector<1x32xf32>
    %48 = vector.extract_strided_slice %46 {offsets = [0, 32], sizes = [1, 32], strides = [1, 1]} : vector<1x64xf32> to vector<1x32xf32>
    %49 = arith.mulf %47, %47 : vector<1x32xf32>
    %50 = arith.subf %48, %49 : vector<1x32xf32>
    %cst_13 = arith.constant 0.000000e+00 : f32
    %51 = vector.broadcast %cst_13 : f32 to vector<1x32xf32>
    %52 = arith.maximumf %50, %51 : vector<1x32xf32>
    %cst_14 = arith.constant 9.99999974E-6 : f32
    %53 = vector.broadcast %cst_14 : f32 to vector<1x32xf32>
    %54 = arith.addf %52, %53 : vector<1x32xf32>
    %55 = math.rsqrt %54 : vector<1x32xf32>
    %56 = arith.mulf %11, %55 : vector<1x32xf32>
    %57 = vector.broadcast %47 : vector<1x32xf32> to vector<8x32xf32>
    %58 = arith.subf %40, %57 : vector<8x32xf32>
    %59 = vector.broadcast %56 : vector<1x32xf32> to vector<8x32xf32>
    %60 = arith.mulf %58, %59 : vector<8x32xf32>
    %61 = vector.broadcast %12 : vector<1x32xf32> to vector<8x32xf32>
    %62 = arith.addf %60, %61 : vector<8x32xf32>
    %cst_15 = arith.constant 0.000000e+00 : f32
    %63 = vector.broadcast %cst_15 : f32 to vector<8x32xf32>
    %64 = arith.maximumf %62, %63 : vector<8x32xf32>
    %c88 = arith.constant 88 : index
    %c0_16 = arith.constant 0 : index
    %65 = vector.load %arg1[%c88, %c0_16] : memref<360x32xf32, #tpu.memory_space<vmem>>, vector<32x32xf32>
    %66 = vector.extract_strided_slice %65 {offsets = [0, 0], sizes = [32, 8], strides = [1, 1]} : vector<32x32xf32> to vector<32x8xf32>
    %cst_17 = arith.constant dense<0.000000e+00> : vector<8x8xf32>
    %67 = tpu.matmul %64, %66, %cst_17 {dimension_numbers = #tpu.dot_dimension_numbers<[1], [0], [0], [1], [0, 0, 1, 1], [], []>} : vector<8x32xf32>, vector<32x8xf32>, vector<8x8xf32> -> vector<8x8xf32>
    %c0_18 = arith.constant 0 : index
    %c0_19 = arith.constant 0 : index
    %c0_20 = arith.constant 0 : index
    %68 = vector.load %arg2[%c0_18, %c0_19, %c0_20] : memref<3x8x8xf32, #tpu.memory_space<vmem>>, vector<1x8x8xf32>
    %69 = vector.shape_cast %68 : vector<1x8x8xf32> to vector<8x8xf32>
    %70 = vector.shape_cast %67 : vector<8x8xf32> to vector<1x8x8xf32>
    tpu.vector_store %arg2[%c0_18, %c0_19, %c0_20], %70 {strides = array<i32>} : memref<3x8x8xf32, #tpu.memory_space<vmem>>, vector<1x8x8xf32>,
    %c56 = arith.constant 56 : index
    %c0_21 = arith.constant 0 : index
    %71 = vector.load %arg1[%c56, %c0_21] : memref<360x32xf32, #tpu.memory_space<vmem>>, vector<32x32xf32>
    %72 = vector.extract_strided_slice %71 {offsets = [0, 0], sizes = [32, 16], strides = [1, 1]} : vector<32x32xf32> to vector<32x16xf32>
    %cst_22 = arith.constant dense<0.000000e+00> : vector<8x16xf32>
    %73 = tpu.matmul %64, %72, %cst_22 {dimension_numbers = #tpu.dot_dimension_numbers<[1], [0], [0], [1], [0, 0, 1, 1], [], []>} : vector<8x32xf32>, vector<32x16xf32>, vector<8x16xf32> -> vector<8x16xf32>
    %74 = vector.extract_strided_slice %73 {offsets = [0, 0], sizes = [8, 15], strides = [1, 1]} : vector<8x16xf32> to vector<8x15xf32>
    %75 = vector.extract_strided_slice %73 {offsets = [0, 1], sizes = [8, 15], strides = [1, 1]} : vector<8x16xf32> to vector<8x15xf32>
    %76 = arith.maximumf %74, %75 : vector<8x15xf32>
    %c168 = arith.constant 168 : index
    %c0_23 = arith.constant 0 : index
    %77 = vector.load %arg1[%c168, %c0_23] : memref<360x32xf32, #tpu.memory_space<vmem>>, vector<8x32xf32>
    %78 = vector.extract_strided_slice %77 {offsets = [0, 0], sizes = [1, 32], strides = [1, 1]} : vector<8x32xf32> to vector<1x32xf32>
    %79 = vector.extract_strided_slice %77 {offsets = [1, 0], sizes = [1, 32], strides = [1, 1]} : vector<8x32xf32> to vector<1x32xf32>
    %80 = vector.extract_strided_slice %77 {offsets = [2, 0], sizes = [1, 32], strides = [1, 1]} : vector<8x32xf32> to vector<1x32xf32>
    %81 = vector.extract_strided_slice %77 {offsets = [3, 0], sizes = [1, 32], strides = [1, 1]} : vector<8x32xf32> to vector<1x32xf32>
    %c120 = arith.constant 120 : index
    %c0_24 = arith.constant 0 : index
    %82 = vector.load %arg1[%c120, %c0_24] : memref<360x32xf32, #tpu.memory_space<vmem>>, vector<15x32xf32>
    %cst_25 = arith.constant dense<0.000000e+00> : vector<8x32xf32>
    %83 = tpu.matmul %76, %82, %cst_25 {dimension_numbers = #tpu.dot_dimension_numbers<[1], [0], [0], [1], [0, 0, 1, 1], [], []>} : vector<8x15xf32>, vector<15x32xf32>, vector<8x32xf32> -> vector<8x32xf32>
    %84 = arith.mulf %83, %83 : vector<8x32xf32>
    %85 = tpu.concatenate %83, %84 in 1 : vector<8x32xf32>, vector<8x32xf32> -> vector<8x64xf32>
    %cst_26 = arith.constant dense<0.000000e+00> : vector<64xf32>
    %86 = vector.multi_reduction <add>, %85, %cst_26 [0] : vector<8x64xf32> to vector<64xf32>
    %87 = vector.shape_cast %86 : vector<64xf32> to vector<1x64xf32>
    %cst_27 = arith.constant 8.000000e+00 : f32
    %88 = vector.broadcast %cst_27 : f32 to vector<1x64xf32>
    %89 = arith.divf %87, %88 : vector<1x64xf32>
    %90 = vector.extract_strided_slice %89 {offsets = [0, 0], sizes = [1, 32], strides = [1, 1]} : vector<1x64xf32> to vector<1x32xf32>
    %91 = vector.extract_strided_slice %89 {offsets = [0, 32], sizes = [1, 32], strides = [1, 1]} : vector<1x64xf32> to vector<1x32xf32>
    %92 = arith.mulf %90, %90 : vector<1x32xf32>
    %93 = arith.subf %91, %92 : vector<1x32xf32>
    %cst_28 = arith.constant 0.000000e+00 : f32
    %94 = vector.broadcast %cst_28 : f32 to vector<1x32xf32>
    %95 = arith.maximumf %93, %94 : vector<1x32xf32>
    %cst_29 = arith.constant 9.99999974E-6 : f32
    %96 = vector.broadcast %cst_29 : f32 to vector<1x32xf32>
    %97 = arith.addf %95, %96 : vector<1x32xf32>
    %98 = math.rsqrt %97 : vector<1x32xf32>
    %99 = arith.mulf %78, %98 : vector<1x32xf32>
    %100 = vector.broadcast %90 : vector<1x32xf32> to vector<8x32xf32>
    %101 = arith.subf %83, %100 : vector<8x32xf32>
    %102 = vector.broadcast %99 : vector<1x32xf32> to vector<8x32xf32>
    %103 = arith.mulf %101, %102 : vector<8x32xf32>
    %104 = vector.broadcast %79 : vector<1x32xf32> to vector<8x32xf32>
    %105 = arith.addf %103, %104 : vector<8x32xf32>
    %cst_30 = arith.constant 0.000000e+00 : f32
    %106 = vector.broadcast %cst_30 : f32 to vector<8x32xf32>
    %107 = arith.maximumf %105, %106 : vector<8x32xf32>
    %c136 = arith.constant 136 : index
    %c0_31 = arith.constant 0 : index
    %108 = vector.load %arg1[%c136, %c0_31] : memref<360x32xf32, #tpu.memory_space<vmem>>, vector<32x32xf32>
    %cst_32 = arith.constant dense<0.000000e+00> : vector<8x32xf32>
    %109 = tpu.matmul %107, %108, %cst_32 {dimension_numbers = #tpu.dot_dimension_numbers<[1], [0], [0], [1], [0, 0, 1, 1], [], []>} : vector<8x32xf32>, vector<32x32xf32>, vector<8x32xf32> -> vector<8x32xf32>
    %110 = arith.mulf %109, %109 : vector<8x32xf32>
    %111 = tpu.concatenate %109, %110 in 1 : vector<8x32xf32>, vector<8x32xf32> -> vector<8x64xf32>
    %cst_33 = arith.constant dense<0.000000e+00> : vector<64xf32>
    %112 = vector.multi_reduction <add>, %111, %cst_33 [0] : vector<8x64xf32> to vector<64xf32>
    %113 = vector.shape_cast %112 : vector<64xf32> to vector<1x64xf32>
    %cst_34 = arith.constant 8.000000e+00 : f32
    %114 = vector.broadcast %cst_34 : f32 to vector<1x64xf32>
    %115 = arith.divf %113, %114 : vector<1x64xf32>
    %116 = vector.extract_strided_slice %115 {offsets = [0, 0], sizes = [1, 32], strides = [1, 1]} : vector<1x64xf32> to vector<1x32xf32>
    %117 = vector.extract_strided_slice %115 {offsets = [0, 32], sizes = [1, 32], strides = [1, 1]} : vector<1x64xf32> to vector<1x32xf32>
    %118 = arith.mulf %116, %116 : vector<1x32xf32>
    %119 = arith.subf %117, %118 : vector<1x32xf32>
    %cst_35 = arith.constant 0.000000e+00 : f32
    %120 = vector.broadcast %cst_35 : f32 to vector<1x32xf32>
    %121 = arith.maximumf %119, %120 : vector<1x32xf32>
    %cst_36 = arith.constant 9.99999974E-6 : f32
    %122 = vector.broadcast %cst_36 : f32 to vector<1x32xf32>
    %123 = arith.addf %121, %122 : vector<1x32xf32>
    %124 = math.rsqrt %123 : vector<1x32xf32>
    %125 = arith.mulf %80, %124 : vector<1x32xf32>
    %126 = vector.broadcast %116 : vector<1x32xf32> to vector<8x32xf32>
    %127 = arith.subf %109, %126 : vector<8x32xf32>
    %128 = vector.broadcast %125 : vector<1x32xf32> to vector<8x32xf32>
    %129 = arith.mulf %127, %128 : vector<8x32xf32>
    %130 = vector.broadcast %81 : vector<1x32xf32> to vector<8x32xf32>
    %131 = arith.addf %129, %130 : vector<8x32xf32>
    %cst_37 = arith.constant 0.000000e+00 : f32
    %132 = vector.broadcast %cst_37 : f32 to vector<8x32xf32>
    %133 = arith.maximumf %131, %132 : vector<8x32xf32>
    %c208 = arith.constant 208 : index
    %c0_38 = arith.constant 0 : index
    %134 = vector.load %arg1[%c208, %c0_38] : memref<360x32xf32, #tpu.memory_space<vmem>>, vector<32x32xf32>
    %135 = vector.extract_strided_slice %134 {offsets = [0, 0], sizes = [32, 8], strides = [1, 1]} : vector<32x32xf32> to vector<32x8xf32>
    %cst_39 = arith.constant dense<0.000000e+00> : vector<8x8xf32>
    %136 = tpu.matmul %133, %135, %cst_39 {dimension_numbers = #tpu.dot_dimension_numbers<[1], [0], [0], [1], [0, 0, 1, 1], [], []>} : vector<8x32xf32>, vector<32x8xf32>, vector<8x8xf32> -> vector<8x8xf32>
    %c1 = arith.constant 1 : index
    %c0_40 = arith.constant 0 : index
    %c0_41 = arith.constant 0 : index
    %137 = vector.load %arg2[%c1, %c0_40, %c0_41] : memref<3x8x8xf32, #tpu.memory_space<vmem>>, vector<1x8x8xf32>
    %138 = vector.shape_cast %137 : vector<1x8x8xf32> to vector<8x8xf32>
    %139 = vector.shape_cast %136 : vector<8x8xf32> to vector<1x8x8xf32>
    tpu.vector_store %arg2[%c1, %c0_40, %c0_41], %139 {strides = array<i32>} : memref<3x8x8xf32, #tpu.memory_space<vmem>>, vector<1x8x8xf32>,
    %c176 = arith.constant 176 : index
    %c0_42 = arith.constant 0 : index
    %140 = vector.load %arg1[%c176, %c0_42] : memref<360x32xf32, #tpu.memory_space<vmem>>, vector<32x32xf32>
    %141 = vector.extract_strided_slice %140 {offsets = [0, 0], sizes = [32, 16], strides = [1, 1]} : vector<32x32xf32> to vector<32x16xf32>
    %cst_43 = arith.constant dense<0.000000e+00> : vector<8x16xf32>
    %142 = tpu.matmul %133, %141, %cst_43 {dimension_numbers = #tpu.dot_dimension_numbers<[1], [0], [0], [1], [0, 0, 1, 1], [], []>} : vector<8x32xf32>, vector<32x16xf32>, vector<8x16xf32> -> vector<8x16xf32>
    %143 = vector.extract_strided_slice %142 {offsets = [0, 0], sizes = [8, 15], strides = [1, 1]} : vector<8x16xf32> to vector<8x15xf32>
    %144 = vector.extract_strided_slice %142 {offsets = [0, 1], sizes = [8, 15], strides = [1, 1]} : vector<8x16xf32> to vector<8x15xf32>
    %145 = arith.maximumf %143, %144 : vector<8x15xf32>
    %c288 = arith.constant 288 : index
    %c0_44 = arith.constant 0 : index
    %146 = vector.load %arg1[%c288, %c0_44] : memref<360x32xf32, #tpu.memory_space<vmem>>, vector<8x32xf32>
    %147 = vector.extract_strided_slice %146 {offsets = [0, 0], sizes = [1, 32], strides = [1, 1]} : vector<8x32xf32> to vector<1x32xf32>
    %148 = vector.extract_strided_slice %146 {offsets = [1, 0], sizes = [1, 32], strides = [1, 1]} : vector<8x32xf32> to vector<1x32xf32>
    %149 = vector.extract_strided_slice %146 {offsets = [2, 0], sizes = [1, 32], strides = [1, 1]} : vector<8x32xf32> to vector<1x32xf32>
    %150 = vector.extract_strided_slice %146 {offsets = [3, 0], sizes = [1, 32], strides = [1, 1]} : vector<8x32xf32> to vector<1x32xf32>
    %c240 = arith.constant 240 : index
    %c0_45 = arith.constant 0 : index
    %151 = vector.load %arg1[%c240, %c0_45] : memref<360x32xf32, #tpu.memory_space<vmem>>, vector<15x32xf32>
    %cst_46 = arith.constant dense<0.000000e+00> : vector<8x32xf32>
    %152 = tpu.matmul %145, %151, %cst_46 {dimension_numbers = #tpu.dot_dimension_numbers<[1], [0], [0], [1], [0, 0, 1, 1], [], []>} : vector<8x15xf32>, vector<15x32xf32>, vector<8x32xf32> -> vector<8x32xf32>
    %153 = arith.mulf %152, %152 : vector<8x32xf32>
    %154 = tpu.concatenate %152, %153 in 1 : vector<8x32xf32>, vector<8x32xf32> -> vector<8x64xf32>
    %cst_47 = arith.constant dense<0.000000e+00> : vector<64xf32>
    %155 = vector.multi_reduction <add>, %154, %cst_47 [0] : vector<8x64xf32> to vector<64xf32>
    %156 = vector.shape_cast %155 : vector<64xf32> to vector<1x64xf32>
    %cst_48 = arith.constant 8.000000e+00 : f32
    %157 = vector.broadcast %cst_48 : f32 to vector<1x64xf32>
    %158 = arith.divf %156, %157 : vector<1x64xf32>
    %159 = vector.extract_strided_slice %158 {offsets = [0, 0], sizes = [1, 32], strides = [1, 1]} : vector<1x64xf32> to vector<1x32xf32>
    %160 = vector.extract_strided_slice %158 {offsets = [0, 32], sizes = [1, 32], strides = [1, 1]} : vector<1x64xf32> to vector<1x32xf32>
    %161 = arith.mulf %159, %159 : vector<1x32xf32>
    %162 = arith.subf %160, %161 : vector<1x32xf32>
    %cst_49 = arith.constant 0.000000e+00 : f32
    %163 = vector.broadcast %cst_49 : f32 to vector<1x32xf32>
    %164 = arith.maximumf %162, %163 : vector<1x32xf32>
    %cst_50 = arith.constant 9.99999974E-6 : f32
    %165 = vector.broadcast %cst_50 : f32 to vector<1x32xf32>
    %166 = arith.addf %164, %165 : vector<1x32xf32>
    %167 = math.rsqrt %166 : vector<1x32xf32>
    %168 = arith.mulf %147, %167 : vector<1x32xf32>
    %169 = vector.broadcast %159 : vector<1x32xf32> to vector<8x32xf32>
    %170 = arith.subf %152, %169 : vector<8x32xf32>
    %171 = vector.broadcast %168 : vector<1x32xf32> to vector<8x32xf32>
    %172 = arith.mulf %170, %171 : vector<8x32xf32>
    %173 = vector.broadcast %148 : vector<1x32xf32> to vector<8x32xf32>
    %174 = arith.addf %172, %173 : vector<8x32xf32>
    %cst_51 = arith.constant 0.000000e+00 : f32
    %175 = vector.broadcast %cst_51 : f32 to vector<8x32xf32>
    %176 = arith.maximumf %174, %175 : vector<8x32xf32>
    %c256 = arith.constant 256 : index
    %c0_52 = arith.constant 0 : index
    %177 = vector.load %arg1[%c256, %c0_52] : memref<360x32xf32, #tpu.memory_space<vmem>>, vector<32x32xf32>
    %cst_53 = arith.constant dense<0.000000e+00> : vector<8x32xf32>
    %178 = tpu.matmul %176, %177, %cst_53 {dimension_numbers = #tpu.dot_dimension_numbers<[1], [0], [0], [1], [0, 0, 1, 1], [], []>} : vector<8x32xf32>, vector<32x32xf32>, vector<8x32xf32> -> vector<8x32xf32>
    %179 = arith.mulf %178, %178 : vector<8x32xf32>
    %180 = tpu.concatenate %178, %179 in 1 : vector<8x32xf32>, vector<8x32xf32> -> vector<8x64xf32>
    %cst_54 = arith.constant dense<0.000000e+00> : vector<64xf32>
    %181 = vector.multi_reduction <add>, %180, %cst_54 [0] : vector<8x64xf32> to vector<64xf32>
    %182 = vector.shape_cast %181 : vector<64xf32> to vector<1x64xf32>
    %cst_55 = arith.constant 8.000000e+00 : f32
    %183 = vector.broadcast %cst_55 : f32 to vector<1x64xf32>
    %184 = arith.divf %182, %183 : vector<1x64xf32>
    %185 = vector.extract_strided_slice %184 {offsets = [0, 0], sizes = [1, 32], strides = [1, 1]} : vector<1x64xf32> to vector<1x32xf32>
    %186 = vector.extract_strided_slice %184 {offsets = [0, 32], sizes = [1, 32], strides = [1, 1]} : vector<1x64xf32> to vector<1x32xf32>
    %187 = arith.mulf %185, %185 : vector<1x32xf32>
    %188 = arith.subf %186, %187 : vector<1x32xf32>
    %cst_56 = arith.constant 0.000000e+00 : f32
    %189 = vector.broadcast %cst_56 : f32 to vector<1x32xf32>
    %190 = arith.maximumf %188, %189 : vector<1x32xf32>
    %cst_57 = arith.constant 9.99999974E-6 : f32
    %191 = vector.broadcast %cst_57 : f32 to vector<1x32xf32>
    %192 = arith.addf %190, %191 : vector<1x32xf32>
    %193 = math.rsqrt %192 : vector<1x32xf32>
    %194 = arith.mulf %149, %193 : vector<1x32xf32>
    %195 = vector.broadcast %185 : vector<1x32xf32> to vector<8x32xf32>
    %196 = arith.subf %178, %195 : vector<8x32xf32>
    %197 = vector.broadcast %194 : vector<1x32xf32> to vector<8x32xf32>
    %198 = arith.mulf %196, %197 : vector<8x32xf32>
    %199 = vector.broadcast %150 : vector<1x32xf32> to vector<8x32xf32>
    %200 = arith.addf %198, %199 : vector<8x32xf32>
    %cst_58 = arith.constant 0.000000e+00 : f32
    %201 = vector.broadcast %cst_58 : f32 to vector<8x32xf32>
    %202 = arith.maximumf %200, %201 : vector<8x32xf32>
    %c328 = arith.constant 328 : index
    %c0_59 = arith.constant 0 : index
    %203 = vector.load %arg1[%c328, %c0_59] : memref<360x32xf32, #tpu.memory_space<vmem>>, vector<32x32xf32>
    %204 = vector.extract_strided_slice %203 {offsets = [0, 0], sizes = [32, 8], strides = [1, 1]} : vector<32x32xf32> to vector<32x8xf32>
    %cst_60 = arith.constant dense<0.000000e+00> : vector<8x8xf32>
    %205 = tpu.matmul %202, %204, %cst_60 {dimension_numbers = #tpu.dot_dimension_numbers<[1], [0], [0], [1], [0, 0, 1, 1], [], []>} : vector<8x32xf32>, vector<32x8xf32>, vector<8x8xf32> -> vector<8x8xf32>
    %c2 = arith.constant 2 : index
    %c0_61 = arith.constant 0 : index
    %c0_62 = arith.constant 0 : index
    %206 = vector.load %arg2[%c2, %c0_61, %c0_62] : memref<3x8x8xf32, #tpu.memory_space<vmem>>, vector<1x8x8xf32>
    %207 = vector.shape_cast %206 : vector<1x8x8xf32> to vector<8x8xf32>
    %208 = vector.shape_cast %205 : vector<8x8xf32> to vector<1x8x8xf32>
    tpu.vector_store %arg2[%c2, %c0_61, %c0_62], %208 {strides = array<i32>} : memref<3x8x8xf32, #tpu.memory_space<vmem>>, vector<1x8x8xf32>,
    return
  }
}

</mosaic_0001>

<bundles_post_ra>
// kernel: _lambda_.1
= control target key start
LH: loop header
LB: loop body
LE: loop exit
PB: predicated region body
PF: predicated region fallthrough
CT: control target
= control target key end

     0   :  { %7 = vsyncpa [#allocation3], 0  ;;  %s1439_s9 = smov [#allocation2]   ;;  %s1613_s0 = inlined_call_operand.vmem [shape: f32[8,16], index: 0, kind: input, shape index: {}]   ;;  %s1614_s1 = inlined_call_operand.hbm [shape: f32[360,32], index: 1, kind: input, shape index: {}]   ;;  %s1615_s2 = inlined_call_operand.vmem [shape: f32[3,8,8], index: 2, kind: output, shape index: {}]  }
   0x1   :  { %s15_s10 = sshll.u32 %s1439_s9, 4  ;;  %s1415_s13 = scalar_lea.hbm %s1614_s1, 5760  ;;  %s16_s10 = int_to_ptr.vmem [resolvable:$true] %s15_s10 }
   0x2   :  { %p1416_p0 = scmp.ne.s32.totalorder %s1614_s1, %s1415_s13  ;;  %p1419_p1 = scmp.lt.u32.totalorder %s1415_s13, %s1614_s1 }
   0x4   :  { %p1421_p2 = pnand %p1419_p1, %p1416_p0 }
   0x6   :  { %1424 = shalt.err (!%p1421_p2)
}
   0x7   :  { %s1425_s18 = scalar_lea.vmem %s16_s10, 5760  ;;  %p1430_p4 = scmp.lt.s32.totalorder %s16_s10, %s16_s10 }
   0x8   :  { %p1426_p3 = scmp.ne.s32.totalorder %s16_s10, %s1425_s18  ;;  %p1431_p5 = scmp.lt.s32.totalorder %s1425_s18, %s1425_s18 }
   0xa   :  { %p1432_p6 = por %p1431_p5, %p1430_p4 }
   0xc   :  { %p1433_p7 = pnand %p1432_p6, %p1426_p3 }
   0xe   :  { %1436 = shalt.err (!%p1433_p7)
}
   0xf   :  { %s1440_s19 = smov 128   ;;  %s1441_s20 = smov 8  }
  0x10   :  { %21 = dma.hbm_to_vmem [thread:$0]  %s1614_s1, 5760, %s16_s10, [#allocation3], %s1440_s19, %s1440_s19, %s1441_s20  }
  0x11   :  { %1437 = dma.done.wait [#allocation3], 5760  }
  0x12   :  { %1438 = vsyncadd [#allocation3], 4294961536  ;;  %v1442_v0 = vmov 0.0|0.0   ;;  %vm1443_vm0 = vmmov 0   ;;  %v1444_v1 = vmov 0.0   ;;  %vm46_vm1 = vcmask 1044480  }
  0x13   :  { %1331 = vmatprep.subr.bf16.mxu0 %v1442_v0  ;;  %1335 = vmatprep.subr.bf16.mxu1 %v1442_v0  ;;  %vm1445_vm2 = vmmov 1   ;;  %v25_v2 = vld [vmem:[%s1613_s0] sm:$0xff]  ;;  %v41_v4 = vld [vmem:[#allocation2 + $0x8] sm:$0x1f]  ;;  %s1446_s24 = smov 127   ;;  %s1447_s25 = smov 125   ;;  %v152_v37 = vlaneseq }
  0x14   :  { %1226 = vmatprep.mubr.msk.f32.mxu0 %vm1443_vm0, %v1444_v1  ;;  %1237 = vmatprep.mubr.msk.f32.mxu1 %vm1443_vm0, %v1444_v1  ;;  %vm1333_vm3 = vmpackc.low %vm46_vm1, %vm1445_vm2  ;;  %v40_v3 = vld [vmem:[#allocation2] sm:$0xff]  ;;  %s1448_s26 = smov 126   ;;  %vm42_vm4 = vcmask 105472   ;;  %s1449_s0 = smov 32   ;;  %vm125_vm5 = vcmask 261120   ;;  %vm127_vm6 = vcmask 523264  }
  0x15   :  { %27 = vrot.lane.b32.xlu0 %v25_v2, %s1446_s24  ;;  %35 = vrot.lane.b32.xlu1 %v25_v2, %s1447_s25  ;;  %v1332_v5 = vpack.c.bf16 %v41_v4, %v40_v3  ;;  %v163_v30 = vld [vmem:[#allocation2 + $0x10] sm:$0xff]  ;;  %v164_v31 = vld [vmem:[#allocation2 + $0x18] sm:$0xff]  ;;  %v165_v33 = vld [vmem:[#allocation2 + $0x20] sm:$0xff]  ;;  %s1450_s27 = smov 96   ;;  %v153_v38 = vshrl.u32 %v152_v37, 7  ;;  %vm446_vm7 = vcmask 1046528  }
  0x16   :  { %v1336_v32 = vpack.c.bf16 %v164_v31, %v163_v30  ;;  %v166_v34 = vld [vmem:[#allocation2 + $0x28] sm:$0xff]  ;;  %v1499_v39 = vld [vmem:[#allocation2 + $0x30] sm:$0xff]  ;;  %vm1536_vm8 = vmpackc.low %vm446_vm7, %vm1445_vm2  ;;  %vm358_vm9 = vcmask 64512   ;;  %vm442_vm10 = vcmask 121856  }
  0x17   :  { %1334 = vmatpush3.bf16.msk.msra.mxu0 %vm1333_vm3, %v1332_v5  ;;  %v1339_v35 = vpack.c.bf16 %v166_v34, %v165_v33  ;;  %v1501_v40 = vsub.s32 0, %v153_v38  ;;  %v1503_v41 = vsub.s32 1, %v153_v38  ;;  %v440_v31 = vld [vmem:[#allocation2 + $0x78] sm:$0xff] }
  0x18   :  { %1341 = vmatprep.subr.bf16.mxu0 %v1442_v0  ;;  %1337 = vmatpush3.bf16.msra.mxu1 %v1336_v32  ;;  %v441_v32 = vld [vmem:[#allocation2 + $0x80] sm:$0x7f] }
  0x19   :  { %31 = vrot.lane.b32.xlu0 %v25_v2, %s1448_s26  ;;  %1338 = vmatprep.subr.bf16.mxu1 %v1442_v0  ;;  %v160_v45 = vrot.slane %v1499_v39, %v1503_v41  ;;  %v1354_v33 = vpack.c.bf16 %v441_v32, %v440_v31 }
  0x1c   :  { %1340 = vmatpush3.bf16.msra.mxu1 %v1339_v35 }
  0x1d   :  { %1347 = vmatprep.subr.bf16.mxu1 %v1442_v0 }
  0x87   :  { %v28_v6 = vpop.permute.xlu0 %27  ;;  %v36_v9 = vpop.permute.xlu1 %35 }
  0x88   :  { %v30_v7 = vmax.f32 %v25_v2, %v28_v6  ;;  %v281_v6 = vld [vmem:[#allocation2 + $0x58] sm:$0xff] }
  0x8b   :  { %v32_v8 = vpop.permute.xlu0 %31 }
  0x8c   :  { %v34_v10 = vmax.f32 %v30_v7, %v32_v8  ;;  %v282_v7 = vld [vmem:[#allocation2 + $0x60] sm:$0xff]  ;;  %v360_v8 = vld [vmem:[#allocation2 + $0x38] sm:$0xff] }
  0x8e   :  { %v38_v11 = vmax.f32 %v34_v10, %v36_v9  ;;  %v1342_v9 = vpack.c.bf16 %v282_v7, %v281_v6  ;;  %v361_v10 = vld [vmem:[#allocation2 + $0x40] sm:$0xff] }
  0x90   :  { %1227 = vmatmul.mubr.msk.f32.vlgmr.msra.gmra.mrb[0].mxu0 %vm42_vm4, %v38_v11  ;;  %v1348_v11 = vpack.c.bf16 %v361_v10, %v360_v8 }
  0x91   :  { %1248 = vmatprep.mubr.msk.f32.mxu0 %vm1443_vm0, %v1444_v1  ;;  %1343 = vmatpush3.bf16.msra.mxu0 %v1342_v9 }
  0x92   :  { %1344 = vmatprep.subr.bf16.mxu0 %v1442_v0 }
 0x163   :  { %v116_v12 = vpop.f32.mrb[0].mxu0 }
 0x164   :  { %v120_v13 = vmul.f32 %v116_v12, %v116_v12  ;;  %v1228_v14 = vpop.f32.mrb[1].mxu0 }
 0x165   :  { %v362_v14 = vld [vmem:[#allocation2 + $0x48] sm:$0xff] }
 0x166   :  { %122 = vrot.lane.b32.xlu1 %v120_v13, %s1449_s0  ;;  %v284_v13 = vld [vmem:[#allocation2 + $0x70] sm:$0xff] }
 0x1d8   :  { %v123_v15 = vpop.permute.xlu1 %122 }
 0x1d9   :  { %v126_v16 = vsel %vm125_vm5, %v116_v12, %v123_v15 }
 0x1da   :  { %v128_v17 = vsel %vm127_vm6, %v126_v16, 0.0  ;;  %v363_v16 = vld [vmem:[#allocation2 + $0x50] sm:$0xff] }
 0x1db   :  { %v129_v18 = vrot.slane %v128_v17, 4 }
 0x1dd   :  { %v130_v19 = vadd.f32 %v129_v18, %v128_v17  ;;  %v1351_v17 = vpack.c.bf16 %v363_v16, %v362_v14 }
 0x1df   :  { %v131_v20 = vrot.slane %v130_v19, 2 }
 0x1e1   :  { %v132_v21 = vadd.f32 %v131_v20, %v130_v19  ;;  %v1521_v20 = vsub.s32 2, %v153_v38 }
 0x1e3   :  { %v133_v22 = vrot.slane %v132_v21, 1 }
 0x1e5   :  { %v134_v23 = vadd.f32 %v133_v22, %v132_v21  ;;  %v1523_v21 = vsub.s32 3, %v153_v38 }
 0x1e7   :  { %v136_v24 = vmul.f32 0.125, %v134_v23 }
 0x1e9   :  { %v137_v25 = vmul.f32 %v136_v24, %v136_v24  ;;  %v151_v44 = vsub.f32 %v116_v12, %v136_v24  ;;  %v283_v12 = vld [vmem:[#allocation2 + $0x68] sm:$0xff] }
 0x1ea   :  { %v1345_v15 = vpack.c.bf16 %v284_v13, %v283_v12 }
 0x1eb   :  { %139 = vrot.lane.b32.xlu0 %v137_v25, %s1449_s0  ;;  %v278_v25 = vrot.slane %v1499_v39, %v1523_v21 }
 0x1ec   :  { %1346 = vmatpush3.bf16.msra.mxu0 %v1345_v15 }
 0x1ed   :  { %1353 = vmatprep.subr.bf16.mxu0 %v1442_v0 }
 0x25d   :  { %v140_v26 = vpop.permute.xlu0 %139 }
 0x25e   :  { %v142_v27 = vsub.f32 %v136_v24, %v140_v26 }
 0x260   :  { %v143_v28 = vmax.f32 %v142_v27, 0.0 }
 0x262   :  { %v144_v29 = vadd.f32 1e-05, %v143_v28 }
 0x264   :  { %1403 = vrsqrt.f32 %v144_v29 }
 0x26e   :  { %v1404_v36 = vpop.eup %1403 }
 0x26f   :  { %147 = vrot.lane.b32.xlu1 %v1404_v36, %s1450_s27 }
 0x2e1   :  { %v148_v42 = vpop.permute.xlu1 %147 }
 0x2e2   :  { %v150_v43 = vmul.f32 %v148_v42, %v1499_v39 }
 0x2e4   :  { %v155_v46 = vrot.slane %v150_v43, %v1501_v40 }
 0x2e6   :  { %v156_v47 = vmul.f32 %v155_v46, %v151_v44 }
 0x2e8   :  { %v161_v48 = vadd.f32 %v160_v45, %v156_v47 }
 0x2ea   :  { %v162_v49 = vmax.f32 %v161_v48, 0.0 }
 0x2ec   :  { %1238 = vmatmul.mubr.msk.f32.vlgmr.msra.gmra.mrb[0].mxu1 %vm125_vm5, %v162_v49 }
 0x2ed   :  { %1259 = vmatprep.mubr.msk.f32.mxu1 %vm1443_vm0, %v1444_v1  ;;  %1349 = vmatpush3.bf16.msra.mxu1 %v1348_v11 }
 0x2ee   :  { %1350 = vmatprep.subr.bf16.mxu1 %v1442_v0 }
 0x2f1   :  { %1352 = vmatpush3.bf16.msra.mxu1 %v1351_v17 }
 0x2f2   :  { %1363 = vmatprep.subr.bf16.mxu1 %v1442_v0 }
 0x3bf   :  { %v236_v50 = vpop.f32.mrb[0].mxu1 }
 0x3c0   :  { %v240_v51 = vmul.f32 %v236_v50, %v236_v50  ;;  %v1239_v52 = vpop.f32.mrb[1].mxu1 }
 0x3c2   :  { %242 = vrot.lane.b32.xlu0 %v240_v51, %s1449_s0 }
 0x434   :  { %v243_v53 = vpop.permute.xlu0 %242 }
 0x435   :  { %v245_v54 = vsel %vm125_vm5, %v236_v50, %v243_v53 }
 0x436   :  { %v246_v55 = vsel %vm127_vm6, %v245_v54, 0.0 }
 0x437   :  { %v247_v56 = vrot.slane %v246_v55, 4 }
 0x439   :  { %v248_v57 = vadd.f32 %v247_v56, %v246_v55 }
 0x43b   :  { %v249_v58 = vrot.slane %v248_v57, 2 }
 0x43d   :  { %v250_v59 = vadd.f32 %v249_v58, %v248_v57 }
 0x43f   :  { %v251_v60 = vrot.slane %v250_v59, 1 }
 0x441   :  { %v252_v61 = vadd.f32 %v251_v60, %v250_v59  ;;  %v560_v60 = vld [vmem:[#allocation2 + $0x88] sm:$0xff] }
 0x443   :  { %v253_v62 = vmul.f32 0.125, %v252_v61  ;;  %v561_v61 = vld [vmem:[#allocation2 + $0x90] sm:$0xff] }
 0x445   :  { %v254_v63 = vmul.f32 %v253_v62, %v253_v62  ;;  %v269_v24 = vsub.f32 %v236_v50, %v253_v62 }
 0x447   :  { %256 = vrot.lane.b32.xlu1 %v254_v63, %s1449_s0  ;;  %v562_v63 = vld [vmem:[#allocation2 + $0x98] sm:$0xff] }
 0x4b9   :  { %v257_v2 = vpop.permute.xlu1 %256 }
 0x4ba   :  { %v259_v3 = vsub.f32 %v253_v62, %v257_v2  ;;  %v1358_v62 = vpack.c.bf16 %v561_v61, %v560_v60  ;;  %v563_v2 = vld [vmem:[#allocation2 + $0xa0] sm:$0xff]  ;;  %v838_v60 = vld [vmem:[#allocation2 + $0xf8] sm:$0x7f] }
 0x4bc   :  { %v260_v4 = vmax.f32 %v259_v3, 0.0  ;;  %v1361_v3 = vpack.c.bf16 %v563_v2, %v562_v63 }
 0x4be   :  { %v261_v5 = vadd.f32 1e-05, %v260_v4 }
 0x4c0   :  { %1405 = vrsqrt.f32 %v261_v5  ;;  %v439_v5 = vld [vmem:[#allocation2 + $0xa8] sm:$0xff] }
 0x4c1   :  { %v557_v9 = vrot.slane %v439_v5, %v1503_v41 }
 0x4ca   :  { %v1406_v18 = vpop.eup %1405 }
 0x4cb   :  { %v264_v19 = vrot.slane %v1406_v18, 6 }
 0x4cd   :  { %265 = vrot.lane.b32.xlu0 %v264_v19, %s1450_s27 }
 0x53f   :  { %v266_v22 = vpop.permute.xlu0 %265 }
 0x540   :  { %v268_v23 = vmul.f32 %v266_v22, %v1499_v39 }
 0x542   :  { %v273_v26 = vrot.slane %v268_v23, %v1521_v20 }
 0x544   :  { %v274_v27 = vmul.f32 %v273_v26, %v269_v24 }
 0x546   :  { %v279_v28 = vadd.f32 %v278_v25, %v274_v27 }
 0x548   :  { %v280_v29 = vmax.f32 %v279_v28, 0.0 }
 0x54a   :  { %1249 = vmatmul.mubr.msk.f32.vlgmr.msra.gmra.mrb[2].mxu0 %vm125_vm5, %v280_v29  ;;  %1260 = vmatmul.mubr.msk.f32.vlgmr.msra.gmra.mrb[2].mxu1 %vm125_vm5, %v280_v29 }
 0x54b   :  { %1266 = vmatprep.mubr.msk.f32.mxu0 %vm1443_vm0, %v1444_v1  ;;  %1288 = vmatprep.mubr.msk.f32.mxu1 %vm1443_vm0, %v1444_v1 }
 0x54c   :  { %1356 = vmatpush3.bf16.msk.msra.mxu0 %vm1536_vm8, %v1354_v33 }
 0x54d   :  { %1357 = vmatprep.subr.bf16.mxu0 %v1442_v0 }
 0x61d   :  { %v354_v34 = vpop.f32.mrb[2].mxu0  ;;  %v430_v35 = vpop.f32.mrb[2].mxu1 }
 0x61e   :  { %359 = vst.msk [vmem:[%s1615_s2] sm:$0xff] %vm358_vm9, %v354_v34  ;;  %435 = vrot.lane.b32.xlu1 %v430_v35, %s1446_s24  ;;  %v1250_v36 = vpop.f32.mrb[3].mxu0  ;;  %v1261_v37 = vpop.f32.mrb[3].mxu1 }
 0x61f   :  { %v679_v36 = vld [vmem:[#allocation2 + $0xd8] sm:$0xff]  ;;  %v757_v37 = vld [vmem:[#allocation2 + $0xb0] sm:$0xff] }
 0x690   :  { %v436_v38 = vpop.permute.xlu1 %435 }
 0x691   :  { %v438_v39 = vmax.f32 %v430_v35, %v436_v38  ;;  %v678_v35 = vld [vmem:[#allocation2 + $0xd0] sm:$0xff] }
 0x692   :  { %v1364_v38 = vpack.c.bf16 %v679_v36, %v678_v35 }
 0x693   :  { %1267 = vmatmul.mubr.msk.f32.vlgmr.msra.gmra.mrb[4].mxu0 %vm442_vm10, %v438_v39  ;;  %v758_v39 = vld [vmem:[#allocation2 + $0xb8] sm:$0xff] }
 0x694   :  { %1277 = vmatprep.mubr.msk.f32.mxu0 %vm1443_vm0, %v1444_v1  ;;  %1359 = vmatpush3.bf16.msra.mxu0 %v1358_v62 }
 0x695   :  { %1360 = vmatprep.subr.bf16.mxu0 %v1442_v0  ;;  %1365 = vmatpush3.bf16.msra.mxu1 %v1364_v38 }
 0x696   :  { %1366 = vmatprep.subr.bf16.mxu1 %v1442_v0 }
 0x698   :  { %1362 = vmatpush3.bf16.msra.mxu0 %v1361_v3 }
 0x699   :  { %1369 = vmatprep.subr.bf16.mxu0 %v1442_v0 }
 0x766   :  { %v516_v42 = vpop.f32.mrb[4].mxu0 }
 0x767   :  { %v520_v43 = vmul.f32 %v516_v42, %v516_v42  ;;  %v1268_v44 = vpop.f32.mrb[5].mxu0 }
 0x768   :  { %v681_v44 = vld [vmem:[#allocation2 + $0xe8] sm:$0xff] }
 0x769   :  { %522 = vrot.lane.b32.xlu0 %v520_v43, %s1449_s0  ;;  %v680_v43 = vld [vmem:[#allocation2 + $0xe0] sm:$0xff] }
 0x7db   :  { %v523_v45 = vpop.permute.xlu0 %522 }
 0x7dc   :  { %v525_v46 = vsel %vm125_vm5, %v516_v42, %v523_v45  ;;  %v759_v45 = vld [vmem:[#allocation2 + $0xc0] sm:$0xff] }
 0x7dd   :  { %v526_v47 = vsel %vm127_vm6, %v525_v46, 0.0  ;;  %v1367_v46 = vpack.c.bf16 %v681_v44, %v680_v43 }
 0x7de   :  { %v527_v48 = vrot.slane %v526_v47, 4 }
 0x7df   :  { %1368 = vmatpush3.bf16.msra.mxu1 %v1367_v46 }
 0x7e0   :  { %v528_v49 = vadd.f32 %v527_v48, %v526_v47  ;;  %v760_v47 = vld [vmem:[#allocation2 + $0xc8] sm:$0xff]  ;;  %1375 = vmatprep.subr.bf16.mxu1 %v1442_v0 }
 0x7e1   :  { %v1373_v48 = vpack.c.bf16 %v760_v47, %v759_v45 }
 0x7e2   :  { %v529_v50 = vrot.slane %v528_v49, 2 }
 0x7e4   :  { %v530_v51 = vadd.f32 %v529_v50, %v528_v49 }
 0x7e6   :  { %v531_v52 = vrot.slane %v530_v51, 1 }
 0x7e8   :  { %v532_v53 = vadd.f32 %v531_v52, %v530_v51 }
 0x7ea   :  { %v533_v54 = vmul.f32 0.125, %v532_v53 }
 0x7ec   :  { %v534_v55 = vmul.f32 %v533_v54, %v533_v54  ;;  %v548_v8 = vsub.f32 %v516_v42, %v533_v54  ;;  %v1370_v42 = vpack.c.bf16 %v758_v39, %v757_v37 }
 0x7ee   :  { %536 = vrot.lane.b32.xlu1 %v534_v55, %s1449_s0 }
 0x860   :  { %v537_v56 = vpop.permute.xlu1 %536 }
 0x861   :  { %v539_v57 = vsub.f32 %v533_v54, %v537_v56  ;;  %v675_v54 = vrot.slane %v439_v5, %v1523_v21 }
 0x863   :  { %v540_v58 = vmax.f32 %v539_v57, 0.0 }
 0x865   :  { %v541_v59 = vadd.f32 1e-05, %v540_v58 }
 0x867   :  { %1407 = vrsqrt.f32 %v541_v59  ;;  %v837_v59 = vld [vmem:[#allocation2 + $0xf0] sm:$0xff] }
 0x868   :  { %v1376_v61 = vpack.c.bf16 %v838_v60, %v837_v59  ;;  %v1073_v59 = vld [vmem:[#allocation2 + $0x148] sm:$0xff]  ;;  %v1074_v60 = vld [vmem:[#allocation2 + $0x150] sm:$0xff] }
 0x871   :  { %v1408_v4 = vpop.eup %1407 }
 0x872   :  { %544 = vrot.lane.b32.xlu0 %v1408_v4, %s1450_s27 }
 0x8e4   :  { %v545_v6 = vpop.permute.xlu0 %544 }
 0x8e5   :  { %v547_v7 = vmul.f32 %v545_v6, %v439_v5 }
 0x8e7   :  { %v552_v10 = vrot.slane %v547_v7, %v1501_v40 }
 0x8e9   :  { %v553_v11 = vmul.f32 %v552_v10, %v548_v8 }
 0x8eb   :  { %v558_v12 = vadd.f32 %v557_v9, %v553_v11 }
 0x8ed   :  { %v559_v13 = vmax.f32 %v558_v12, 0.0 }
 0x8ef   :  { %1278 = vmatmul.mubr.msk.f32.vlgmr.msra.gmra.mrb[6].mxu0 %vm125_vm5, %v559_v13 }
 0x8f0   :  { %1299 = vmatprep.mubr.msk.f32.mxu0 %vm1443_vm0, %v1444_v1  ;;  %1371 = vmatpush3.bf16.msra.mxu0 %v1370_v42 }
 0x8f1   :  { %1372 = vmatprep.subr.bf16.mxu0 %v1442_v0 }
 0x8f4   :  { %1374 = vmatpush3.bf16.msra.mxu0 %v1373_v48 }
 0x8f5   :  { %1385 = vmatprep.subr.bf16.mxu0 %v1442_v0 }
 0x9c2   :  { %v633_v14 = vpop.f32.mrb[6].mxu0 }
 0x9c3   :  { %v637_v15 = vmul.f32 %v633_v14, %v633_v14  ;;  %v1279_v16 = vpop.f32.mrb[7].mxu0 }
 0x9c5   :  { %639 = vrot.lane.b32.xlu1 %v637_v15, %s1449_s0 }
 0xa37   :  { %v640_v17 = vpop.permute.xlu1 %639 }
 0xa38   :  { %v642_v18 = vsel %vm125_vm5, %v633_v14, %v640_v17 }
 0xa39   :  { %v643_v19 = vsel %vm127_vm6, %v642_v18, 0.0 }
 0xa3a   :  { %v644_v22 = vrot.slane %v643_v19, 4 }
 0xa3c   :  { %v645_v23 = vadd.f32 %v644_v22, %v643_v19 }
 0xa3e   :  { %v646_v24 = vrot.slane %v645_v23, 2 }
 0xa40   :  { %v647_v25 = vadd.f32 %v646_v24, %v645_v23  ;;  %v955_v24 = vld [vmem:[#allocation2 + $0x100] sm:$0xff] }
 0xa42   :  { %v648_v26 = vrot.slane %v647_v25, 1 }
 0xa44   :  { %v649_v27 = vadd.f32 %v648_v26, %v647_v25  ;;  %v956_v25 = vld [vmem:[#allocation2 + $0x108] sm:$0xff] }
 0xa45   :  { %v1380_v26 = vpack.c.bf16 %v956_v25, %v955_v24 }
 0xa46   :  { %v650_v28 = vmul.f32 0.125, %v649_v27  ;;  %v957_v27 = vld [vmem:[#allocation2 + $0x110] sm:$0xff] }
 0xa48   :  { %v651_v29 = vmul.f32 %v650_v28, %v650_v28  ;;  %v666_v53 = vsub.f32 %v633_v14, %v650_v28 }
 0xa4a   :  { %653 = vrot.lane.b32.xlu0 %v651_v29, %s1449_s0 }
 0xabc   :  { %v654_v31 = vpop.permute.xlu0 %653 }
 0xabd   :  { %v656_v32 = vsub.f32 %v650_v28, %v654_v31  ;;  %v958_v28 = vld [vmem:[#allocation2 + $0x118] sm:$0xff] }
 0xabe   :  { %v1383_v29 = vpack.c.bf16 %v958_v28, %v957_v27 }
 0xabf   :  { %v657_v33 = vmax.f32 %v656_v32, 0.0  ;;  %v836_v32 = vld [vmem:[#allocation2 + $0x120] sm:$0xff] }
 0xac0   :  { %v952_v36 = vrot.slane %v836_v32, %v1503_v41 }
 0xac1   :  { %v658_v34 = vadd.f32 1e-05, %v657_v33 }
 0xac3   :  { %1409 = vrsqrt.f32 %v658_v34 }
 0xacd   :  { %v1410_v49 = vpop.eup %1409 }
 0xace   :  { %v661_v50 = vrot.slane %v1410_v49, 6 }
 0xad0   :  { %662 = vrot.lane.b32.xlu1 %v661_v50, %s1450_s27 }
 0xb42   :  { %v663_v51 = vpop.permute.xlu1 %662 }
 0xb43   :  { %v665_v52 = vmul.f32 %v663_v51, %v439_v5 }
 0xb45   :  { %v670_v55 = vrot.slane %v665_v52, %v1521_v20 }
 0xb47   :  { %v671_v56 = vmul.f32 %v670_v55, %v666_v53 }
 0xb49   :  { %v676_v57 = vadd.f32 %v675_v54, %v671_v56 }
 0xb4b   :  { %v677_v58 = vmax.f32 %v676_v57, 0.0 }
 0xb4d   :  { %1289 = vmatmul.mubr.msk.f32.vlgmr.msra.gmra.mrb[4].mxu1 %vm125_vm5, %v677_v58  ;;  %1300 = vmatmul.mubr.msk.f32.vlgmr.msra.gmra.mrb[8].mxu0 %vm125_vm5, %v677_v58 }
 0xb4e   :  { %1306 = vmatprep.mubr.msk.f32.mxu1 %vm1443_vm0, %v1444_v1  ;;  %1328 = vmatprep.mubr.msk.f32.mxu0 %vm1443_vm0, %v1444_v1 }
 0xb4f   :  { %1378 = vmatpush3.bf16.msk.msra.mxu1 %vm1536_vm8, %v1376_v61  ;;  %v1386_v61 = vpack.c.bf16 %v1074_v60, %v1073_v59 }
 0xb50   :  { %1379 = vmatprep.subr.bf16.mxu1 %v1442_v0 }
 0xb51   :  { %1387 = vmatpush3.bf16.msra.mxu0 %v1386_v61 }
 0xb52   :  { %1388 = vmatprep.subr.bf16.mxu0 %v1442_v0 }
 0xc20   :  { %v751_v62 = vpop.f32.mrb[4].mxu1  ;;  %v827_v63 = vpop.f32.mrb[8].mxu0 }
 0xc21   :  { %1166 = vst.msk [vmem:[%s1615_s2 + $0x8] sm:$0xff] %vm358_vm9, %v751_v62  ;;  %v1290_v2 = vpop.f32.mrb[5].mxu1  ;;  %832 = vrot.lane.b32.xlu0 %v827_v63, %s1446_s24  ;;  %v1301_v3 = vpop.f32.mrb[9].mxu0  ;;  %v1075_v62 = vld [vmem:[#allocation2 + $0x158] sm:$0xff] }
 0xc93   :  { %v833_v4 = vpop.permute.xlu0 %832 }
 0xc94   :  { %v835_v5 = vmax.f32 %v827_v63, %v833_v4  ;;  %v1076_v63 = vld [vmem:[#allocation2 + $0x160] sm:$0xff] }
 0xc95   :  { %v1389_v2 = vpack.c.bf16 %v1076_v63, %v1075_v62 }
 0xc96   :  { %1307 = vmatmul.mubr.msk.f32.vlgmr.msra.gmra.mrb[6].mxu1 %vm442_vm10, %v835_v5 }
 0xc97   :  { %1317 = vmatprep.mubr.msk.f32.mxu1 %vm1443_vm0, %v1444_v1  ;;  %1381 = vmatpush3.bf16.msra.mxu1 %v1380_v26 }
 0xc98   :  { %1382 = vmatprep.subr.bf16.mxu1 %v1442_v0  ;;  %1390 = vmatpush3.bf16.msra.mxu0 %v1389_v2 }
 0xc9b   :  { %1384 = vmatpush3.bf16.msra.mxu1 %v1383_v29 }
 0xd69   :  { %v911_v30 = vpop.f32.mrb[6].mxu1 }
 0xd6a   :  { %v915_v6 = vmul.f32 %v911_v30, %v911_v30  ;;  %v1308_v7 = vpop.f32.mrb[7].mxu1 }
 0xd6b   :  { %v1070_v7 = vrot.slane %v836_v32, %v1523_v21 }
 0xd6c   :  { %917 = vrot.lane.b32.xlu1 %v915_v6, %s1449_s0 }
 0xdde   :  { %v918_v8 = vpop.permute.xlu1 %917 }
 0xddf   :  { %v920_v9 = vsel %vm125_vm5, %v911_v30, %v918_v8 }
 0xde0   :  { %v921_v10 = vsel %vm127_vm6, %v920_v9, 0.0 }
 0xde1   :  { %v922_v11 = vrot.slane %v921_v10, 4 }
 0xde3   :  { %v923_v12 = vadd.f32 %v922_v11, %v921_v10 }
 0xde5   :  { %v924_v13 = vrot.slane %v923_v12, 2 }
 0xde7   :  { %v925_v14 = vadd.f32 %v924_v13, %v923_v12 }
 0xde9   :  { %v926_v15 = vrot.slane %v925_v14, 1 }
 0xdeb   :  { %v927_v16 = vadd.f32 %v926_v15, %v925_v14 }
 0xded   :  { %v928_v17 = vmul.f32 0.125, %v927_v16 }
 0xdef   :  { %v929_v18 = vmul.f32 %v928_v17, %v928_v17  ;;  %v943_v35 = vsub.f32 %v911_v30, %v928_v17 }
 0xdf1   :  { %931 = vrot.lane.b32.xlu0 %v929_v18, %s1449_s0 }
 0xe63   :  { %v932_v1 = vpop.permute.xlu0 %931 }
 0xe64   :  { %v934_v19 = vsub.f32 %v928_v17, %v932_v1 }
 0xe66   :  { %v935_v22 = vmax.f32 %v934_v19, 0.0 }
 0xe68   :  { %v936_v23 = vadd.f32 1e-05, %v935_v22 }
 0xe6a   :  { %1411 = vrsqrt.f32 %v936_v23 }
 0xe74   :  { %v1412_v31 = vpop.eup %1411 }
 0xe75   :  { %939 = vrot.lane.b32.xlu1 %v1412_v31, %s1450_s27 }
 0xee7   :  { %v940_v33 = vpop.permute.xlu1 %939 }
 0xee8   :  { %v942_v34 = vmul.f32 %v940_v33, %v836_v32 }
 0xeea   :  { %v947_v37 = vrot.slane %v942_v34, %v1501_v40 }
 0xeec   :  { %v948_v38 = vmul.f32 %v947_v37, %v943_v35 }
 0xeee   :  { %v953_v39 = vadd.f32 %v952_v36, %v948_v38 }
 0xef0   :  { %v954_v42 = vmax.f32 %v953_v39, 0.0 }
 0xef2   :  { %1318 = vmatmul.mubr.msk.f32.vlgmr.msra.gmra.mrb[8].mxu1 %vm125_vm5, %v954_v42 }
 0xfc5   :  { %v1028_v43 = vpop.f32.mrb[8].mxu1 }
 0xfc6   :  { %v1032_v44 = vmul.f32 %v1028_v43, %v1028_v43  ;;  %v1319_v45 = vpop.f32.mrb[9].mxu1 }
 0xfc8   :  { %1034 = vrot.lane.b32.xlu0 %v1032_v44, %s1449_s0 }
0x103a   :  { %v1035_v46 = vpop.permute.xlu0 %1034 }
0x103b   :  { %v1037_v47 = vsel %vm125_vm5, %v1028_v43, %v1035_v46 }
0x103c   :  { %v1038_v48 = vsel %vm127_vm6, %v1037_v47, 0.0 }
0x103d   :  { %v1039_v49 = vrot.slane %v1038_v48, 4 }
0x103f   :  { %v1040_v50 = vadd.f32 %v1039_v49, %v1038_v48 }
0x1041   :  { %v1041_v41 = vrot.slane %v1040_v50, 2 }
0x1043   :  { %v1042_v51 = vadd.f32 %v1041_v41, %v1040_v50 }
0x1045   :  { %v1043_v40 = vrot.slane %v1042_v51, 1 }
0x1047   :  { %v1044_v52 = vadd.f32 %v1043_v40, %v1042_v51 }
0x1049   :  { %v1045_v53 = vmul.f32 0.125, %v1044_v52 }
0x104b   :  { %v1046_v54 = vmul.f32 %v1045_v53, %v1045_v53  ;;  %v1061_v6 = vsub.f32 %v1028_v43, %v1045_v53 }
0x104d   :  { %1048 = vrot.lane.b32.xlu1 %v1046_v54, %s1449_s0 }
0x10bf   :  { %v1049_v55 = vpop.permute.xlu1 %1048 }
0x10c0   :  { %v1051_v56 = vsub.f32 %v1045_v53, %v1049_v55 }
0x10c2   :  { %v1052_v57 = vmax.f32 %v1051_v56, 0.0 }
0x10c4   :  { %v1053_v58 = vadd.f32 1e-05, %v1052_v57 }
0x10c6   :  { %1413 = vrsqrt.f32 %v1053_v58 }
0x10d0   :  { %v1414_v3 = vpop.eup %1413 }
0x10d1   :  { %v1056_v4 = vrot.slane %v1414_v3, 6 }
0x10d3   :  { %1057 = vrot.lane.b32.xlu0 %v1056_v4, %s1450_s27 }
0x1145   :  { %v1058_v5 = vpop.permute.xlu0 %1057 }
0x1146   :  { %v1060_v30 = vmul.f32 %v1058_v5, %v836_v32 }
0x1148   :  { %v1065_v8 = vrot.slane %v1060_v30, %v1521_v20 }
0x114a   :  { %v1066_v9 = vmul.f32 %v1065_v8, %v1061_v6 }
0x114c   :  { %v1071_v10 = vadd.f32 %v1070_v7, %v1066_v9 }
0x114e   :  { %v1072_v11 = vmax.f32 %v1071_v10, 0.0 }
0x1150   :  { %1329 = vmatmul.mubr.msk.f32.vlgmr.msra.gmra.mrb[10].mxu0 %vm125_vm5, %v1072_v11 }
0x1223   :  { %v1146_v0 = vpop.f32.mrb[10].mxu0 }
0x1224   :  { %1172 = vst.msk [vmem:[%s1615_s2 + $0x10] sm:$0xff] %vm358_vm9, %v1146_v0  ;;  %v1330_v12 = vpop.f32.mrb[11].mxu0 }
0x1225   :  { %1156 = vsyncpa [#allocation3], 1 }

</bundles_post_ra>
